<compile_context>
chip_gen: v7x
topology: tpu7x:2x2x1
jax: 0.10.0
libtpu: 0.0.40
codegen_flags: <defaults>
</compile_context>

<pallas_src>
import jax
import jax.numpy as jnp
from jax.experimental import pallas as pl
from jax.experimental.pallas import tpu as pltpu


def _round_up(x, m):
    return ((x + m - 1) // m) * m


def _patch_embed_kernel(patches_ref, w_ref, b_ref, out_ref):
    # (TM, Kp) @ (Kp, Ep) on the MXU with f32 accumulation, + bias broadcast.
    acc = jnp.dot(patches_ref[...], w_ref[...],
                  preferred_element_type=jnp.float32)
    out_ref[...] = (acc + b_ref[...].astype(jnp.float32)).astype(out_ref.dtype)


def patch_embedding_forward(x, weight, bias, patch_size, *, tm=512,
                            use_bf16=False):
    """ViT patch embedding: Conv2d(C,E,kernel=P,stride=P) -> flatten -> transpose.

    x:      (B, C, H, W) NCHW
    weight: (E, C, P, P)   (PyTorch Conv2d weight layout)
    bias:   (E,)
    Returns (B, N, E), N = (H//P)*(W//P).
    """
    B, C, H, W = x.shape
    E = weight.shape[0]
    P = patch_size
    nh, nw = H // P, W // P
    N = nh * nw
    M = B * N
    K = C * P * P
    out_dtype = x.dtype

    # --- glue: extract non-overlapping patches, flattened in (c, kh, kw)
    # order (matches Conv2d weight.reshape(E, C*P*P) contraction order).
    patches = x.reshape(B, C, nh, P, nw, P)
    patches = patches.transpose(0, 2, 4, 1, 3, 5).reshape(M, K)
    w_mat = weight.reshape(E, K).T          # (K, E)
    b_mat = bias.reshape(1, E)

    if use_bf16:
        # bf16 operands, f32 accumulation: halves HBM traffic on the dominant
        # patch stream and unlocks full MXU rate.
        patches = patches.astype(jnp.bfloat16)
        w_mat = w_mat.astype(jnp.bfloat16)

    # --- pad to TPU-friendly shapes -------------------------------------
    # E, K -> multiples of 128 (lane-dense stores, (8,128) block constraint);
    # M -> multiple of the row tile so the grid divides evenly.
    Ep = _round_up(E, 128)
    Kp = _round_up(K, 128)
    TM = _round_up(min(tm, _round_up(M, 8)), 8)
    Mp = _round_up(M, TM)

    if (Mp, Kp) != (M, K):
        patches = jnp.pad(patches, ((0, Mp - M), (0, Kp - K)))
    if (Kp, Ep) != (K, E):
        w_mat = jnp.pad(w_mat, ((0, Kp - K), (0, Ep - E)))
    if Ep != E:
        b_mat = jnp.pad(b_mat, ((0, 0), (0, Ep - E)))

    # TODO(synk): if K (= C*P*P) ever grows past the VMEM budget, add a
    # trailing "arbitrary" K grid axis with a VMEM f32 accumulator (P3).
    grid = (Mp // TM,)

    bytes_per_elem = 2 if use_bf16 else 4
    cost = pl.CostEstimate(
        flops=2 * Mp * Kp * Ep,
        transcendentals=0,
        bytes_accessed=bytes_per_elem * (Mp * Kp + Kp * Ep) + 4 * Mp * Ep,
    )

    out = pl.pallas_call(
        _patch_embed_kernel,
        out_shape=jax.ShapeDtypeStruct((Mp, Ep), out_dtype),
        grid=grid,
        in_specs=[
            # Patch row-tile: streamed / double-buffered across the grid.
            pl.BlockSpec((TM, Kp), lambda i: (i, 0)),
            # Weight + bias: constant index_map -> VMEM-resident.
            pl.BlockSpec((Kp, Ep), lambda i: (0, 0)),
            pl.BlockSpec((1, Ep), lambda i: (0, 0)),
        ],
        out_specs=pl.BlockSpec((TM, Ep), lambda i: (i, 0)),
        compiler_params=pltpu.CompilerParams(
            # Row tiles are independent -> shard across both TCs on v7x.
            dimension_semantics=("parallel",),
        ),
        cost_estimate=cost,
    )(patches, w_mat, b_mat)

    # Strip padding and restore (B, N, E).
    return out[:M, :E].reshape(B, N, E)


if __name__ == "__main__":
    # Shapes consistent with the module defaults (image_size=32, patch_size=8,
    # in_channels=3, embed_dim=256), small batch.  tm=64 gives a 2-step grid
    # so the tiled/pipelined path is exercised even at toy size.
    B, C, H, W = 8, 3, 32, 32
    P = 8
    E = 256

    key = jax.random.PRNGKey(0)
    kx, kw, kb = jax.random.split(key, 3)

    x = jax.random.normal(kx, (B, C, H, W), dtype=jnp.float32)
    # Deterministic synthetic init (Conv2d weight shape (E, C, P, P), bias (E,))
    weight = jax.random.normal(kw, (E, C, P, P), dtype=jnp.float32) * 0.02
    bias = jax.random.normal(kb, (E,), dtype=jnp.float32) * 0.01

    out = patch_embedding_forward(x, weight, bias, P, tm=64)
    out = jax.block_until_ready(out)

    # sanity check against a pure-JAX reference (same patch-as-matmul math)
    nh, nw = H // P, W // P
    ref_patches = x.reshape(B, C, nh, P, nw, P).transpose(0, 2, 4, 1, 3, 5)
    ref_patches = ref_patches.reshape(B * nh * nw, C * P * P)
    ref = (ref_patches @ weight.reshape(E, -1).T + bias).reshape(B, nh * nw, E)

    assert out.shape == (B, nh * nw, E)
    assert jnp.allclose(out, ref, atol=1e-4, rtol=1e-4)

    print("KERNEL_OK")
</pallas_src>

<mosaic_0001>
module attributes {stable_mosaic.version = 11 : i64} {
  func.func @_patch_embed_kernel(%arg0: i32, %arg1: memref<64x256xf32, #tpu.memory_space<vmem>>, %arg2: memref<256x256xf32, #tpu.memory_space<vmem>>, %arg3: memref<1x256xf32, #tpu.memory_space<vmem>>, %arg4: memref<64x256xf32, #tpu.memory_space<vmem>>) attributes {dimension_semantics = [#tpu.dimension_semantics<parallel>], iteration_bounds = array<i64: 2>, scalar_prefetch = 0 : i64, scratch_operands = 0 : i64, tpu.core_type = #tpu.core_type<tc>, window_params = [{transform_indices = @transform_0, window_bounds = array<i64: 64, 256>}, {pipeline_mode = #tpu.pipeline_mode<synchronous>, transform_indices = @transform_1, window_bounds = array<i64: 256, 256>}, {pipeline_mode = #tpu.pipeline_mode<synchronous>, transform_indices = @transform_2, window_bounds = array<i64: 1, 256>}, {transform_indices = @transform_3, window_bounds = array<i64: 64, 256>}]} {
    %c0 = arith.constant 0 : index
    %c0_0 = arith.constant 0 : index
    %0 = vector.load %arg1[%c0, %c0_0] : memref<64x256xf32, #tpu.memory_space<vmem>>, vector<64x256xf32>
    %c0_1 = arith.constant 0 : index
    %c0_2 = arith.constant 0 : index
    %1 = vector.load %arg2[%c0_1, %c0_2] : memref<256x256xf32, #tpu.memory_space<vmem>>, vector<256x256xf32>
    %cst = arith.constant dense<0.000000e+00> : vector<64x256xf32>
    %2 = tpu.matmul %0, %1, %cst {dimension_numbers = #tpu.dot_dimension_numbers<[1], [0], [0], [1], [0, 0, 1, 1], [], []>} : vector<64x256xf32>, vector<256x256xf32>, vector<64x256xf32> -> vector<64x256xf32>
    %c0_3 = arith.constant 0 : index
    %c0_4 = arith.constant 0 : index
    %3 = vector.load %arg3[%c0_3, %c0_4] : memref<1x256xf32, #tpu.memory_space<vmem>>, vector<1x256xf32>
    %4 = vector.broadcast %3 : vector<1x256xf32> to vector<64x256xf32>
    %5 = arith.addf %2, %4 : vector<64x256xf32>
    %c0_5 = arith.constant 0 : index
    %c0_6 = arith.constant 0 : index
    %6 = vector.load %arg4[%c0_5, %c0_6] : memref<64x256xf32, #tpu.memory_space<vmem>>, vector<64x256xf32>
    tpu.vector_store %arg4[%c0_5, %c0_6], %5 {strides = array<i32>} : memref<64x256xf32, #tpu.memory_space<vmem>>, vector<64x256xf32>,
    return
  }
  func.func @transform_0(%arg0: i32) -> (i32, i32) {
    %c0_i32 = arith.constant 0 : i32
    %c0_i32_0 = arith.constant 0 : i32
    return %arg0, %c0_i32 : i32, i32
  }
  func.func @transform_1(%arg0: i32) -> (i32, i32) {
    %c0_i32 = arith.constant 0 : i32
    %c0_i32_0 = arith.constant 0 : i32
    %c0_i32_1 = arith.constant 0 : i32
    return %c0_i32, %c0_i32_0 : i32, i32
  }
  func.func @transform_2(%arg0: i32) -> (i32, i32) {
    %c0_i32 = arith.constant 0 : i32
    %c0_i32_0 = arith.constant 0 : i32
    %c0_i32_1 = arith.constant 0 : i32
    return %c0_i32, %c0_i32_0 : i32, i32
  }
  func.func @transform_3(%arg0: i32) -> (i32, i32) {
    %c0_i32 = arith.constant 0 : i32
    %c0_i32_0 = arith.constant 0 : i32
    return %arg0, %c0_i32 : i32, i32
  }
}

</mosaic_0001>

<bundles_post_ra>
// kernel: tpu_custom_call.1
= control target key start
LH: loop header
LB: loop body
LE: loop exit
PB: predicated region body
PF: predicated region fallthrough
CT: control target
= control target key end

     0   :  { %8 = vsyncpa [#allocation3], 0  ;;  %s1113_s0 = inlined_call_operand.hbm [shape: f32[128,256], index: 0, kind: input, shape index: {}]   ;;  %s1114_s1 = inlined_call_operand.hbm [shape: f32[256,256], index: 1, kind: input, shape index: {}]   ;;  %s1115_s2 = inlined_call_operand.vmem [shape: f32[1,256], index: 2, kind: input, shape index: {}]   ;;  %s1116_s3 = inlined_call_operand.hbm [shape: f32[128,256], index: 3, kind: output, shape index: {}]  }
   0x1   :  { %10 = vsyncpa [#allocation3 + $0x1], 0 }
   0x2   :  { %11 = vsyncpa [#allocation6], 0 }
   0x3   :  { %12 = vsyncpa [#allocation4], 0 }
   0x4   :  { %14 = vsyncpa [#allocation4 + $0x1], 0  ;;  %s862_s12 = smov 0   ;;  %s864_s13 = smov 0  }
   0x5   :  { %s866_s14 = smov 0   ;;  %s868_s15 = smov 0  }
   0x6 LB: > { %s883_s16 = sadd.s32 4294967295, %s833_s15   ;;  %s526_s17 = sadd.s32 4294967294, %s833_s15   ;;  %s833_s15 = sphi %s868_s15, %s1136_s15   ;;  %s829_s14 = sphi %s866_s14, %s1135_s14   ;;  %s825_s13 = sphi %s864_s13, %s1134_s13   ;;  %s821_s12 = sphi %s862_s12, %s1133_s12  }
   0x7   : > { %p40_p0 = scmp.ne.s32.totalorder %s825_s13, %s821_s12  ;;  %p1117_p1 = scmp.eq.s32.totalorder %s883_s16, 0 }
   0x8   : > { %p112_p3 = scmp.eq.s32.totalorder %s526_s17, 1  ;;  %p527_p5 = scmp.ge.s32.totalorder %s833_s15, 1 }
   0x9   : > { %p892_p4 = por %p1117_p1, %p40_p0  ;;  %p119_p7 = scmp.lt.s32.totalorder %s833_s15, 3 }
   0xa   : > { %p897_p6 = por %p112_p3, %p40_p0  ;;  %s835_s21 = smov [#allocation5]  }
   0xb   : > { %s1120_s18 = scalar_select %p892_p4, 1, 0 }
   0xc   : > { %s1121_s19 = scalar_select %p897_p6, 1, 0 }
   0xd   : > { %p902_p8 = pnand %p527_p5, %p119_p7  ;;  %s131_s22 = sshll.u32 %s835_s21, 4  ;;  %s906_s22 = int_to_ptr.vmem [resolvable:$true] %s131_s22 }
   0xe   : > { %s918_s24 = sadd.s32 1, %s833_s15   ;;  %s27_s25 = sadd.s32 1, %s829_s14 }
   0xf   : > { %s1122_s20 = scalar_select %p902_p8, 1, 0 }
  0x10   : > { %p652_p9 = pneg %p902_p8  ;;  %s24_s26 = ssub.s32 %s833_s15, %s918_s24 }
  0x11   : > { %s705_s29 = scalar_lea.hbm %s1114_s1, 8192 }
  0x12   : > { %p913_p11 = pnand %p652_p9, %p1117_p1  ;;  %p706_p12 = scmp.ne.s32.totalorder %s1114_s1, %s705_s29 }
  0x13   : > { %p712_p5 = scmp.lt.u32.totalorder %s705_s29, %s1114_s1 }
  0x14   : > { %p707_p13 = pneg %p913_p11 }
  0x16   : > { %p708_p0 = pnand %p707_p13, %p706_p12 }
  0x18   : > { %p709_p3 = pneg %p708_p0 }
  0x1a   : > { %p714_p7 = pnand %p712_p5, %p709_p3 }
  0x1c   : > { %717 = shalt.err (!%p714_p7)
}
  0x1d   : > { %s718_s7 = scalar_lea.vmem %s906_s22, 8192  ;;  %p726_p2 = scmp.lt.s32.totalorder %s906_s22, %s906_s22 }
  0x1e   : > { %p719_p9 = scmp.ne.s32.totalorder %s906_s22, %s718_s7  ;;  %p727_p6 = scmp.lt.s32.totalorder %s718_s7, %s718_s7 }
  0x20   : > { %p721_p10 = pnand %p719_p9, %p707_p13  ;;  %p728_p4 = por %p727_p6, %p726_p2 }
  0x22   : > { %p722_p1 = pneg %p721_p10 }
  0x24   : > { %p729_p8 = pnand %p728_p4, %p722_p1 }
  0x26   : > { %732 = shalt.err (!%p729_p8)
}
  0x27   : > { %s836_s8 = smov 256   ;;  %s837_s9 = smov 16  }
  0x28   : > { %655 = dma.hbm_to_vmem [thread:$0]  (!%p913_p11), %s1114_s1, 8192, %s906_s22, [#allocation6], %s836_s8, %s836_s8, %s837_s9  }
  0x29   : > { %p25_p1 = scmp.eq.s32.totalorder %s24_s26, 0  ;;  %p34_p2 = scmp.ne.s32.totalorder %s829_s14, %s825_s13 }
  0x2a   : > { %p35_p4 = scmp.eq.s32.totalorder %s833_s15, 0  ;;  %p665_p6 = scmp.lt.s32.totalorder %s833_s15, 2 }
  0x2b   : > { %s952_s17 = scalar_select %p25_p1, %s829_s14, %s27_s25  }
  0x2c   : > { %p36_p8 = por %p35_p4, %p34_p2  ;;  %p1124_p10 = scmp.eq.s32.totalorder %s883_s16, 1 }
  0x2d   : > { %s148_s23 = sand.u32 1, %s829_s14   ;;  %s545_s27 = sshll.u32 %s833_s15, 11 }
  0x2e   : > { %p956_p12 = por %p1124_p10, %p34_p2  ;;  %s530_s28 = sshll.u32 %s148_s23, 7 }
  0x2f   : > { %s965_s4 = scalar_lea.hbm %s1113_s0, %s545_s27  ;;  %s152_s22 = scalar_lea.vmem [#allocation2], %s530_s28 }
  0x30   : > { %s160_s25 = sshll.u32 %s152_s22, 4  ;;  %p967_p11 = pnand %p665_p6, %p36_p8  ;;  %s971_s25 = int_to_ptr.vmem [resolvable:$true] %s160_s25 }
  0x31   : > { %s973_s5 = scalar_lea.sflag [#allocation3], %s148_s23  ;;  %s733_s6 = scalar_lea.hbm %s965_s4, 2048 }
  0x32   : > { %p734_p13 = scmp.ne.s32.totalorder %s965_s4, %s733_s6  ;;  %p735_p0 = pneg %p967_p11 }
  0x33   : > { %s738_s11 = scalar_lea.hbm %s1113_s0, 4096  ;;  %p739_p7 = scmp.lt.u32.totalorder %s965_s4, %s1113_s0 }
  0x34   : > { %p736_p3 = pnand %p735_p0, %p734_p13  ;;  %p740_p9 = scmp.lt.u32.totalorder %s738_s11, %s733_s6 }
  0x35   : > { %p742_p2 = scmp.lt.u32.totalorder %s733_s6, %s965_s4 }
  0x36   : > { %p737_p5 = pneg %p736_p3  ;;  %p741_p1 = por %p740_p9, %p739_p7 }
  0x38   : > { %p743_p4 = por %p742_p2, %p741_p1 }
  0x3a   : > { %p744_p6 = pnand %p743_p4, %p737_p5 }
  0x3c   : > { %747 = shalt.err (!%p744_p6)
}
  0x3d   : > { %s748_s23 = scalar_lea.vmem %s971_s25, 2048  ;;  %s838_s29 = smov [#allocation2]  }
  0x3e   : > { %p749_p8 = scmp.ne.s32.totalorder %s971_s25, %s748_s23  ;;  %s753_s30 = sshll.u32 %s838_s29, 4  ;;  %s754_s30 = int_to_ptr.vmem [resolvable:$false] %s753_s30 }
  0x3f   : > { %s755_s22 = scalar_lea.vmem %s754_s30, 4096  ;;  %p756_p3 = scmp.lt.s32.totalorder %s971_s25, %s754_s30 }
  0x40   : > { %p751_p10 = pnand %p749_p8, %p735_p0  ;;  %p757_p7 = scmp.lt.s32.totalorder %s755_s22, %s748_s23 }
  0x42   : > { %p752_p13 = pneg %p751_p10  ;;  %p758_p9 = por %p757_p7, %p756_p3 }
  0x44   : > { %p759_p1 = pnand %p758_p9, %p752_p13 }
  0x46   : > { %762 = shalt.err (!%p759_p1)
}
  0x47   : > { %659 = dma.hbm_to_vmem [thread:$0]  (!%p967_p11), %s965_s4, 2048, %s971_s25, %s973_s5, %s836_s8, %s836_s8, %s837_s9  }
  0x48   : > { %p1127_p0 = scmp.ne.s32.totalorder %s1122_s20, 0 }
  0x49   : > { %s1007_s6 = sand.u32 (!%p1127_p0), 1, %s825_s13   ;;  %p1128_p5 = scmp.ne.s32.totalorder (!%p1127_p0), %s1120_s18, 0 }
  0x4a   : > { %172 = sbr.rel (%p1127_p0) target bundleno = 394 (0x18a), region = 32  ;;  %s535_s7 = sshll.u32 (!%p1127_p0), %s1007_s6, 7 }
  0x4b   : > { %s175_s10 = scalar_lea.sflag (!%p1127_p0), [#allocation3], %s1007_s6  ;;  %s1013_s26 = scalar_lea.vmem (!%p1127_p0), [#allocation2], %s535_s7 }
  0x51   : > { %808 = dma.done.wait (%p1128_p5), %s175_s10, 2048  }
  0x52   : > { %810 = vsyncadd (%p1128_p5), %s175_s10, 4294965248  ;;  %p1129_p11 = scmp.eq.s32.totalorder %s883_s16, 0 }
  0x54   : > { %812 = dma.done.wait (%p1129_p11), [#allocation6], 8192   ;;  %p1130_p2 = pmov %p1129_p11 }
  0x55   : > { %v224_v0 = vld [vmem:[#allocation5 + $0x8] sm:$0xff]  ;;  %v226_v1 = vld [vmem:[#allocation5 + $0x18] sm:$0xff]  ;;  %v223_v2 = vld [vmem:[#allocation5] sm:$0xff]  ;;  %s1044_s8 = scalar_lea.vmem [#allocation7], %s535_s7  ;;  %s547_s9 = sshll.u32 %s883_s16, 11 }
  0x56   : > { %814 = vsyncadd (%p1130_p2), [#allocation6], 4294959104  ;;  %v548_v3 = vpack.c.bf16 %v226_v1, %v224_v0  ;;  %v225_v4 = vld [vmem:[#allocation5 + $0x10] sm:$0xff]  ;;  %v228_v5 = vld [vmem:[#allocation5 + $0x28] sm:$0xff]  ;;  %s443_s4 = sshll.u32 %s1044_s8, 4  ;;  %s1063_s16 = scalar_lea.hbm %s1116_s3, %s547_s9  ;;  %s1065_s4 = int_to_ptr.vmem [resolvable:$true] %s443_s4 }
  0x57   : > { %v230_v6 = vld [vmem:[#allocation5 + $0x38] sm:$0xff]  ;;  %v550_v7 = vpack.c.bf16 %v225_v4, %v223_v2  ;;  %v227_v9 = vld [vmem:[#allocation5 + $0x20] sm:$0xff]  ;;  %v229_v10 = vld [vmem:[#allocation5 + $0x30] sm:$0xff]  ;;  %s429_s11 = scalar_lea.sflag [#allocation4], %s1007_s6  ;;  %s763_s27 = scalar_lea.vmem %s1065_s4, 2048 }
  0x58   : > { %v552_v8 = vpack.c.bf16 %v230_v6, %v228_v5  ;;  %v232_v11 = vld [vmem:[#allocation5 + $0x48] sm:$0xff]  ;;  %549 = vmatprep.subr.bf16.mxu0 %v548_v3  ;;  %612 = vmatprep.subr.bf16.mxu1 %v548_v3  ;;  %v234_v12 = vld [vmem:[#allocation5 + $0x58] sm:$0xff]  ;;  %v554_v13 = vpack.c.bf16 %v229_v10, %v227_v9  ;;  %v231_v15 = vld [vmem:[#allocation5 + $0x40] sm:$0xff]  ;;  %p764_p4 = scmp.ne.s32.totalorder %s1065_s4, %s763_s27  ;;  %s839_s28 = smov [#allocation7]  }
  0x59   : > { %551 = vmatpush1.bf16.msra.mxu0 %v550_v7  ;;  %628 = vmatpush1.bf16.msra.mxu1 %v550_v7  ;;  %v556_v14 = vpack.c.bf16 %v234_v12, %v232_v11  ;;  %v233_v16 = vld [vmem:[#allocation5 + $0x50] sm:$0xff]  ;;  %v236_v17 = vld [vmem:[#allocation5 + $0x68] sm:$0xff]  ;;  %v238_v18 = vld [vmem:[#allocation5 + $0x78] sm:$0xff]  ;;  %s767_s23 = sshll.u32 %s839_s28, 4  ;;  %s768_s23 = int_to_ptr.vmem [resolvable:$false] %s767_s23 }
  0x5a   : > { %553 = vmatprep.subr.bf16.mxu0 %v552_v8  ;;  %613 = vmatprep.subr.bf16.mxu1 %v552_v8  ;;  %v558_v19 = vpack.c.bf16 %v233_v16, %v231_v15  ;;  %v560_v20 = vpack.c.bf16 %v238_v18, %v236_v17  ;;  %v235_v21 = vld [vmem:[#allocation5 + $0x60] sm:$0xff]  ;;  %v237_v22 = vld [vmem:[#allocation5 + $0x70] sm:$0xff]  ;;  %v240_v23 = vld [vmem:[#allocation5 + $0x88] sm:$0xff]  ;;  %p765_p6 = pnand %p764_p4, %p956_p12  ;;  %s769_s29 = scalar_lea.vmem %s768_s23, 4096 }
  0x5b   : > { %v242_v24 = vld [vmem:[#allocation5 + $0x98] sm:$0xff]  ;;  %v562_v25 = vpack.c.bf16 %v237_v22, %v235_v21  ;;  %v239_v27 = vld [vmem:[#allocation5 + $0x80] sm:$0xff]  ;;  %v241_v28 = vld [vmem:[#allocation5 + $0x90] sm:$0xff]  ;;  %p770_p10 = scmp.lt.s32.totalorder %s1065_s4, %s768_s23  ;;  %p771_p13 = scmp.lt.s32.totalorder %s769_s29, %s763_s27 }
  0x5c   : > { %v564_v26 = vpack.c.bf16 %v242_v24, %v240_v23  ;;  %v244_v29 = vld [vmem:[#allocation5 + $0xa8] sm:$0xff]  ;;  %v246_v30 = vld [vmem:[#allocation5 + $0xb8] sm:$0xff]  ;;  %v566_v31 = vpack.c.bf16 %v241_v28, %v239_v27  ;;  %v243_v33 = vld [vmem:[#allocation5 + $0xa0] sm:$0xff]  ;;  %p766_p8 = pneg %p765_p6 }
  0x5d   : > { %555 = vmatpush1.bf16.msra.mxu0 %v554_v13  ;;  %629 = vmatpush1.bf16.msra.mxu1 %v554_v13  ;;  %v568_v32 = vpack.c.bf16 %v246_v30, %v244_v29  ;;  %v245_v34 = vld [vmem:[#allocation5 + $0xb0] sm:$0xff]  ;;  %v248_v35 = vld [vmem:[#allocation5 + $0xc8] sm:$0xff]  ;;  %v250_v36 = vld [vmem:[#allocation5 + $0xd8] sm:$0xff]  ;;  %p772_p3 = por %p771_p13, %p770_p10 }
  0x5e   : > { %557 = vmatprep.subr.bf16.mxu0 %v556_v14  ;;  %614 = vmatprep.subr.bf16.mxu1 %v556_v14  ;;  %v570_v37 = vpack.c.bf16 %v245_v34, %v243_v33  ;;  %v247_v38 = vld [vmem:[#allocation5 + $0xc0] sm:$0xff]  ;;  %v572_v39 = vpack.c.bf16 %v250_v36, %v248_v35  ;;  %v249_v40 = vld [vmem:[#allocation5 + $0xd0] sm:$0xff]  ;;  %v208_v41 = vld [vmem:[%s1013_s26 + $0x8] sm:$0xff] }
  0x5f   : > { %v216_v42 = vld [vmem:[%s1013_s26 + $0x48] sm:$0xff]  ;;  %v254_v44 = vld [vmem:[#allocation5 + $0xf8] sm:$0xff]  ;;  %363 = vmatprep.mubr.f32.mxu0 %v208_v41  ;;  %v574_v45 = vpack.c.bf16 %v249_v40, %v247_v38  ;;  %v251_v47 = vld [vmem:[#allocation5 + $0xe0] sm:$0xff]  ;;  %p773_p7 = pnand %p772_p3, %p766_p8 }
  0x60   : > { %v252_v43 = vld [vmem:[#allocation5 + $0xe8] sm:$0xff]  ;;  %387 = vmatprep.mubr.f32.mxu1 %v216_v42  ;;  %v253_v48 = vld [vmem:[#allocation5 + $0xf0] sm:$0xff]  ;;  %v258_v50 = vld [vmem:[#allocation5 + $0x118] sm:$0xff] }
  0x61   : > { %559 = vmatpush1.bf16.msra.mxu0 %v558_v19  ;;  %630 = vmatpush1.bf16.msra.mxu1 %v558_v19  ;;  %v576_v46 = vpack.c.bf16 %v254_v44, %v252_v43  ;;  %v256_v49 = vld [vmem:[#allocation5 + $0x108] sm:$0xff]  ;;  %v578_v51 = vpack.c.bf16 %v253_v48, %v251_v47  ;;  %v255_v53 = vld [vmem:[#allocation5 + $0x100] sm:$0xff]  ;;  %v257_v54 = vld [vmem:[#allocation5 + $0x110] sm:$0xff]  ;;  %v289_v48 = vlaneseq }
  0x62   : > { %561 = vmatprep.subr.bf16.mxu0 %v560_v20  ;;  %615 = vmatprep.subr.bf16.mxu1 %v560_v20  ;;  %v580_v52 = vpack.c.bf16 %v258_v50, %v256_v49  ;;  %v260_v55 = vld [vmem:[#allocation5 + $0x128] sm:$0xff]  ;;  %v262_v56 = vld [vmem:[#allocation5 + $0x138] sm:$0xff]  ;;  %v582_v57 = vpack.c.bf16 %v257_v54, %v255_v53  ;;  %v259_v59 = vld [vmem:[#allocation5 + $0x120] sm:$0xff] }
  0x63   : > { %v584_v58 = vpack.c.bf16 %v262_v56, %v260_v55  ;;  %v261_v60 = vld [vmem:[#allocation5 + $0x130] sm:$0xff]  ;;  %v264_v61 = vld [vmem:[#allocation5 + $0x148] sm:$0xff]  ;;  %v266_v62 = vld [vmem:[#allocation5 + $0x158] sm:$0xff]  ;;  %v290_v49 = vshrl.u32 %v289_v48, 7 }
  0x64   : > { %v586_v63 = vpack.c.bf16 %v261_v60, %v259_v59  ;;  %v588_v0 = vpack.c.bf16 %v266_v62, %v264_v61  ;;  %v263_v1 = vld [vmem:[#allocation5 + $0x140] sm:$0xff]  ;;  %v265_v2 = vld [vmem:[#allocation5 + $0x150] sm:$0xff]  ;;  %v268_v3 = vld [vmem:[#allocation5 + $0x168] sm:$0xff] }
  0x65   : > { %563 = vmatpush1.bf16.msra.mxu0 %v562_v25  ;;  %631 = vmatpush1.bf16.msra.mxu1 %v562_v25  ;;  %v270_v4 = vld [vmem:[#allocation5 + $0x178] sm:$0xff]  ;;  %v590_v5 = vpack.c.bf16 %v265_v2, %v263_v1  ;;  %v267_v7 = vld [vmem:[#allocation5 + $0x160] sm:$0xff]  ;;  %v269_v8 = vld [vmem:[#allocation5 + $0x170] sm:$0xff]  ;;  %v291_v50 = vsub.s32 0, %v290_v49 }
  0x66   : > { %565 = vmatprep.subr.bf16.mxu0 %v564_v26  ;;  %616 = vmatprep.subr.bf16.mxu1 %v564_v26  ;;  %v592_v6 = vpack.c.bf16 %v270_v4, %v268_v3  ;;  %v272_v9 = vld [vmem:[#allocation5 + $0x188] sm:$0xff]  ;;  %v274_v10 = vld [vmem:[#allocation5 + $0x198] sm:$0xff]  ;;  %v594_v11 = vpack.c.bf16 %v269_v8, %v267_v7  ;;  %v271_v13 = vld [vmem:[#allocation5 + $0x180] sm:$0xff] }
  0x67   : > { %v596_v12 = vpack.c.bf16 %v274_v10, %v272_v9  ;;  %v273_v14 = vld [vmem:[#allocation5 + $0x190] sm:$0xff]  ;;  %v276_v15 = vld [vmem:[#allocation5 + $0x1a8] sm:$0xff]  ;;  %v278_v16 = vld [vmem:[#allocation5 + $0x1b8] sm:$0xff] }
  0x68   : > { %v598_v17 = vpack.c.bf16 %v273_v14, %v271_v13  ;;  %v600_v18 = vpack.c.bf16 %v278_v16, %v276_v15  ;;  %v275_v19 = vld [vmem:[#allocation5 + $0x1a0] sm:$0xff]  ;;  %v277_v20 = vld [vmem:[#allocation5 + $0x1b0] sm:$0xff]  ;;  %v280_v21 = vld [vmem:[#allocation5 + $0x1c8] sm:$0xff] }
  0x69   : > { %567 = vmatpush1.bf16.msra.mxu0 %v566_v31  ;;  %632 = vmatpush1.bf16.msra.mxu1 %v566_v31  ;;  %v282_v22 = vld [vmem:[#allocation5 + $0x1d8] sm:$0xff]  ;;  %v602_v23 = vpack.c.bf16 %v277_v20, %v275_v19  ;;  %v279_v25 = vld [vmem:[#allocation5 + $0x1c0] sm:$0xff]  ;;  %v281_v26 = vld [vmem:[#allocation5 + $0x1d0] sm:$0xff] }
  0x6a   : > { %569 = vmatprep.subr.bf16.mxu0 %v568_v32  ;;  %617 = vmatprep.subr.bf16.mxu1 %v568_v32  ;;  %v604_v24 = vpack.c.bf16 %v282_v22, %v280_v21  ;;  %v284_v27 = vld [vmem:[#allocation5 + $0x1e8] sm:$0xff]  ;;  %v286_v28 = vld [vmem:[#allocation5 + $0x1f8] sm:$0xff]  ;;  %v606_v29 = vpack.c.bf16 %v281_v26, %v279_v25  ;;  %v283_v31 = vld [vmem:[#allocation5 + $0x1e0] sm:$0xff] }
  0x6b   : > { %v608_v30 = vpack.c.bf16 %v286_v28, %v284_v27  ;;  %v285_v32 = vld [vmem:[#allocation5 + $0x1f0] sm:$0xff]  ;;  %v207_v34 = vld [vmem:[%s1013_s26] sm:$0xff]  ;;  %v210_v36 = vld [vmem:[%s1013_s26 + $0x18] sm:$0xff] }
  0x6c   : > { %v610_v33 = vpack.c.bf16 %v285_v32, %v283_v31  ;;  %v215_v35 = vld [vmem:[%s1013_s26 + $0x40] sm:$0xff]  ;;  %v209_v38 = vld [vmem:[%s1013_s26 + $0x10] sm:$0xff]  ;;  %v212_v40 = vld [vmem:[%s1013_s26 + $0x28] sm:$0xff] }
  0x6d   : > { %571 = vmatpush1.bf16.msra.mxu0 %v570_v37  ;;  %633 = vmatpush1.bf16.msra.mxu1 %v570_v37  ;;  %v218_v37 = vld [vmem:[%s1013_s26 + $0x58] sm:$0xff]  ;;  %v220_v41 = vld [vmem:[%s1013_s26 + $0x68] sm:$0xff]  ;;  %v211_v42 = vld [vmem:[%s1013_s26 + $0x20] sm:$0xff] }
  0x6e   : > { %573 = vmatprep.subr.bf16.mxu0 %v572_v39  ;;  %618 = vmatprep.subr.bf16.mxu1 %v572_v39  ;;  %v217_v39 = vld [vmem:[%s1013_s26 + $0x50] sm:$0xff]  ;;  %v219_v43 = vld [vmem:[%s1013_s26 + $0x60] sm:$0xff]  ;;  %v214_v44 = vld [vmem:[%s1013_s26 + $0x38] sm:$0xff] }
  0x6f   : > { %v221_v47 = vld [vmem:[%s1013_s26 + $0x70] sm:$0xff] }
  0x71   : > { %575 = vmatpush1.bf16.msra.mxu0 %v574_v45  ;;  %634 = vmatpush1.bf16.msra.mxu1 %v574_v45  ;;  %v222_v45 = vld [vmem:[%s1013_s26 + $0x78] sm:$0xff] }
  0x72   : > { %577 = vmatprep.subr.bf16.mxu0 %v576_v46  ;;  %619 = vmatprep.subr.bf16.mxu1 %v576_v46  ;;  %v213_v46 = vld [vmem:[%s1013_s26 + $0x30] sm:$0xff] }
  0x75   : > { %579 = vmatpush1.bf16.msra.mxu0 %v578_v51  ;;  %635 = vmatpush1.bf16.msra.mxu1 %v578_v51  ;;  %v287_v51 = vld [vmem:[%s1115_s2] sm:$0x3] }
  0x76   : > { %581 = vmatprep.subr.bf16.mxu0 %v580_v52  ;;  %620 = vmatprep.subr.bf16.mxu1 %v580_v52  ;;  %v295_v52 = vsub.s32 1, %v290_v49  ;;  %v292_v53 = vrot.slane %v287_v51, %v291_v50 }
  0x78   : > { %v296_v54 = vrot.slane %v287_v51, %v295_v52 }
  0x79   : > { %583 = vmatpush1.bf16.msra.mxu0 %v582_v57  ;;  %636 = vmatpush1.bf16.msra.mxu1 %v582_v57 }
  0x7a   : > { %585 = vmatprep.subr.bf16.mxu0 %v584_v58  ;;  %621 = vmatprep.subr.bf16.mxu1 %v584_v58 }
  0x7d   : > { %587 = vmatpush1.bf16.msra.mxu0 %v586_v63  ;;  %637 = vmatpush1.bf16.msra.mxu1 %v586_v63 }
  0x7e   : > { %589 = vmatprep.subr.bf16.mxu0 %v588_v0  ;;  %622 = vmatprep.subr.bf16.mxu1 %v588_v0 }
  0x81   : > { %591 = vmatpush1.bf16.msra.mxu0 %v590_v5  ;;  %638 = vmatpush1.bf16.msra.mxu1 %v590_v5 }
  0x82   : > { %593 = vmatprep.subr.bf16.mxu0 %v592_v6  ;;  %623 = vmatprep.subr.bf16.mxu1 %v592_v6 }
  0x85   : > { %595 = vmatpush1.bf16.msra.mxu0 %v594_v11  ;;  %639 = vmatpush1.bf16.msra.mxu1 %v594_v11 }
  0x86   : > { %597 = vmatprep.subr.bf16.mxu0 %v596_v12  ;;  %624 = vmatprep.subr.bf16.mxu1 %v596_v12 }
  0x89   : > { %599 = vmatpush1.bf16.msra.mxu0 %v598_v17  ;;  %640 = vmatpush1.bf16.msra.mxu1 %v598_v17 }
  0x8a   : > { %601 = vmatprep.subr.bf16.mxu0 %v600_v18  ;;  %625 = vmatprep.subr.bf16.mxu1 %v600_v18 }
  0x8d   : > { %603 = vmatpush1.bf16.msra.mxu0 %v602_v23  ;;  %641 = vmatpush1.bf16.msra.mxu1 %v602_v23 }
  0x8e   : > { %605 = vmatprep.subr.bf16.mxu0 %v604_v24  ;;  %626 = vmatprep.subr.bf16.mxu1 %v604_v24 }
  0x91   : > { %607 = vmatpush1.bf16.msra.mxu0 %v606_v29  ;;  %642 = vmatpush1.bf16.msra.mxu1 %v606_v29 }
  0x92   : > { %609 = vmatprep.subr.bf16.mxu0 %v608_v30  ;;  %627 = vmatprep.subr.bf16.mxu1 %v608_v30 }
  0x95   : > { %611 = vmatpush1.bf16.msra.mxu0 %v610_v33  ;;  %643 = vmatpush1.bf16.msra.mxu1 %v610_v33 }
  0x98   : > { %364 = vmatmul.mubr.f32.vlgmr.msra.gmra.mrb[0].mxu0 %v207_v34  ;;  %388 = vmatmul.mubr.f32.vlgmr.msra.gmra.mrb[0].mxu1 %v215_v35 }
  0x99   : > { %369 = vmatprep.mubr.f32.mxu0 %v210_v36  ;;  %393 = vmatprep.mubr.f32.mxu1 %v218_v37 }
  0x9c   : > { %370 = vmatmul.mubr.f32.gmra.mrb[2].mxu0 %v209_v38  ;;  %394 = vmatmul.mubr.f32.gmra.mrb[2].mxu1 %v217_v39 }
  0x9d   : > { %375 = vmatprep.mubr.f32.mxu0 %v212_v40  ;;  %399 = vmatprep.mubr.f32.mxu1 %v220_v41 }
  0xa0   : > { %376 = vmatmul.mubr.f32.gmra.mrb[4].mxu0 %v211_v42  ;;  %400 = vmatmul.mubr.f32.gmra.mrb[4].mxu1 %v219_v43 }
  0xa1   : > { %381 = vmatprep.mubr.f32.mxu0 %v214_v44  ;;  %405 = vmatprep.mubr.f32.mxu1 %v222_v45 }
  0xa4   : > { %382 = vmatmul.mubr.f32.gmra.mrb[6].mxu0 %v213_v46  ;;  %406 = vmatmul.mubr.f32.gmra.mrb[6].mxu1 %v221_v47 }
 0x16b   : > { %v365_v55 = vpop.f32.mrb[0].mxu0  ;;  %v389_v56 = vpop.f32.mrb[0].mxu1 }
 0x16c   : > { %v366_v57 = vadd.f32 %v365_v55, %v292_v53  ;;  %v390_v58 = vadd.f32 %v389_v56, %v292_v53  ;;  %v367_v59 = vpop.f32.mrb[1].mxu0  ;;  %v391_v60 = vpop.f32.mrb[1].mxu1 }
 0x16d   : > { %v368_v61 = vadd.f32 %v367_v59, %v296_v54  ;;  %v392_v62 = vadd.f32 %v391_v60, %v296_v54 }
 0x16e   : > { %412 = vst [vmem:[%s1044_s8] sm:$0xff] %v366_v57  ;;  %420 = vst [vmem:[%s1044_s8 + $0x40] sm:$0xff] %v390_v58 }
 0x16f   : > { %413 = vst [vmem:[%s1044_s8 + $0x8] sm:$0xff] %v368_v61  ;;  %421 = vst [vmem:[%s1044_s8 + $0x48] sm:$0xff] %v392_v62  ;;  %v371_v63 = vpop.f32.mrb[2].mxu0  ;;  %v395_v0 = vpop.f32.mrb[2].mxu1 }
 0x170   : > { %v372_v1 = vadd.f32 %v371_v63, %v292_v53  ;;  %v396_v2 = vadd.f32 %v395_v0, %v292_v53  ;;  %v373_v3 = vpop.f32.mrb[3].mxu0  ;;  %v397_v4 = vpop.f32.mrb[3].mxu1 }
 0x171   : > { %v374_v5 = vadd.f32 %v373_v3, %v296_v54  ;;  %v398_v6 = vadd.f32 %v397_v4, %v296_v54 }
 0x172   : > { %414 = vst [vmem:[%s1044_s8 + $0x10] sm:$0xff] %v372_v1  ;;  %422 = vst [vmem:[%s1044_s8 + $0x50] sm:$0xff] %v396_v2 }
 0x173   : > { %415 = vst [vmem:[%s1044_s8 + $0x18] sm:$0xff] %v374_v5  ;;  %423 = vst [vmem:[%s1044_s8 + $0x58] sm:$0xff] %v398_v6  ;;  %v377_v7 = vpop.f32.mrb[4].mxu0  ;;  %v401_v8 = vpop.f32.mrb[4].mxu1 }
 0x174   : > { %v378_v9 = vadd.f32 %v377_v7, %v292_v53  ;;  %v402_v10 = vadd.f32 %v401_v8, %v292_v53  ;;  %v379_v11 = vpop.f32.mrb[5].mxu0  ;;  %v403_v12 = vpop.f32.mrb[5].mxu1 }
 0x175   : > { %v380_v13 = vadd.f32 %v379_v11, %v296_v54  ;;  %v404_v14 = vadd.f32 %v403_v12, %v296_v54 }
 0x176   : > { %416 = vst [vmem:[%s1044_s8 + $0x20] sm:$0xff] %v378_v9  ;;  %424 = vst [vmem:[%s1044_s8 + $0x60] sm:$0xff] %v402_v10 }
 0x177   : > { %417 = vst [vmem:[%s1044_s8 + $0x28] sm:$0xff] %v380_v13  ;;  %425 = vst [vmem:[%s1044_s8 + $0x68] sm:$0xff] %v404_v14  ;;  %v383_v15 = vpop.f32.mrb[6].mxu0  ;;  %v407_v16 = vpop.f32.mrb[6].mxu1 }
 0x178   : > { %v384_v17 = vadd.f32 %v383_v15, %v292_v53  ;;  %v408_v18 = vadd.f32 %v407_v16, %v292_v53  ;;  %v385_v19 = vpop.f32.mrb[7].mxu0  ;;  %v409_v20 = vpop.f32.mrb[7].mxu1 }
 0x179   : > { %v386_v21 = vadd.f32 %v385_v19, %v296_v54  ;;  %v410_v22 = vadd.f32 %v409_v20, %v296_v54 }
 0x17a   : > { %418 = vst [vmem:[%s1044_s8 + $0x30] sm:$0xff] %v384_v17  ;;  %426 = vst [vmem:[%s1044_s8 + $0x70] sm:$0xff] %v408_v18 }
 0x17b   : > { %419 = vst [vmem:[%s1044_s8 + $0x38] sm:$0xff] %v386_v21  ;;  %427 = vst [vmem:[%s1044_s8 + $0x78] sm:$0xff] %v410_v22 }
 0x17c   : > { %776 = shalt.err (!%p773_p7)
}
 0x17d   : > { %s777_s30 = scalar_lea.hbm %s1063_s16, 2048  ;;  %s781_s10 = scalar_lea.hbm %s1116_s3, 4096 }
 0x17e   : > { %p778_p9 = scmp.ne.s32.totalorder %s1063_s16, %s777_s30  ;;  %p782_p5 = scmp.lt.u32.totalorder %s1063_s16, %s1116_s3 }
 0x17f   : > { %p783_p11 = scmp.lt.u32.totalorder %s781_s10, %s777_s30  ;;  %p785_p4 = scmp.lt.u32.totalorder %s777_s30, %s1063_s16 }
 0x180   : > { %p779_p1 = pnand %p778_p9, %p956_p12 }
 0x181   : > { %p784_p2 = por %p783_p11, %p782_p5 }
 0x182   : > { %p780_p0 = pneg %p779_p1 }
 0x183   : > { %p786_p6 = por %p785_p4, %p784_p2 }
 0x185   : > { %p787_p8 = pnand %p786_p6, %p780_p0 }
 0x187   : > { %790 = shalt.err (!%p787_p8)
}
 0x188   : > { %s840_s20 = smov 256   ;;  %s841_s8 = smov 16  }
 0x189   : > { %650 = dma.vmem_to_hbm [thread:$0]  (%p956_p12), %s1065_s4, 2048, %s1063_s16, %s429_s11, %s840_s20, %s840_s20, %s841_s8  }
 0x18a PF: > { %s458_s9 = sand.u32 1, %s821_s12   ;;  %p1131_p10 = scmp.ne.s32.totalorder %s1121_s19, 0 }
 0x18b   : > { %p1132_p13 = scmp.ge.s32.totalorder %s833_s15, 2  ;;  %s459_s25 = scalar_lea.sflag [#allocation4], %s458_s9 }
 0x18d   : > { %p661_p3 = pnand %p1132_p13, %p1131_p10 }
 0x18f   : > { %816 = dma.done.wait (!%p661_p3), %s459_s25, 2048  }
 0x190   : > { %818 = vsyncadd (!%p661_p3), %s459_s25, 4294965248  ;;  %p17_p7 = scmp.ge.s32.totalorder %s918_s24, 4   ;;  %s1133_s12 = smov %s825_s13 }
 0x191   : > { %s1134_s13 = smov %s829_s14  ;;  %s1135_s14 = smov %s952_s17 }
 0x192   : > { %s1136_s15 = smov %s918_s24  ;;  %19 = sbr.rel (!%p17_p7) target bundleno = 6 (0x6), region = 81 }
 0x199   :  { %464 = vsyncpa [#allocation3], 1 }
 0x19a   :  { %466 = vsyncpa [#allocation3 + $0x1], 1 }
 0x19b   :  { %467 = vsyncpa [#allocation6], 1 }
 0x19c   :  { %468 = vsyncpa [#allocation4], 1 }
 0x19d   :  { %470 = vsyncpa [#allocation4 + $0x1], 1 }

</bundles_post_ra>
